<compile_context>
chip_gen: v6e
topology: v6e:2x2x1
jax: 0.10.0
libtpu: 0.0.40
codegen_flags: <defaults>
</compile_context>

<pallas_src>
import jax
import jax.numpy as jnp
from jax.experimental import pallas as pl
from jax.experimental.pallas import tpu as pltpu


def _mlp_kernel(x_ref, w1_ref, b1_ref, w2_ref, b2_ref, o_ref):
    # First linear (MXU, bf16 operands, f32 accumulation) + bias + ReLU (VPU, f32).
    h = jnp.dot(x_ref[...], w1_ref[...], preferred_element_type=jnp.float32)
    h = jnp.maximum(h + b1_ref[...], 0.0)          # b1 is (1, hidden) -> sublane bcast
    # Second linear (cast activations back to bf16 for the MXU).
    y = jnp.dot(h.astype(w2_ref.dtype), w2_ref[...],
                preferred_element_type=jnp.float32)
    o_ref[...] = (y + b2_ref[...]).astype(o_ref.dtype)   # b2 is (1, c_out_pad)


def _round_up(n, m):
    return ((n + m - 1) // m) * m


def simple_camera_pose_encoder(x, w1, b1, w2, b2, *, tb_max=256):
    """x: [B, c_in]; w1: [c_in, hidden]; b1: [hidden]; w2: [hidden, c_out]; b2: [c_out].

    Returns f32 [B, c_out] = relu(x @ w1 + b1) @ w2 + b2 (bf16 matmuls, f32 accum).
    """
    B, c_in = x.shape
    hidden = w1.shape[1]
    c_out = w2.shape[1]

    # --- Lane-dense output: pad output columns to a multiple of 128. ---
    c_out_pad = _round_up(c_out, 128)
    if c_out_pad != c_out:
        w2p = jnp.zeros((hidden, c_out_pad), w2.dtype).at[:, :c_out].set(w2)
        b2p = jnp.zeros((c_out_pad,), b2.dtype).at[:c_out].set(b2)
    else:
        w2p, b2p = w2, b2

    # --- Batch tiling: TB multiple of 8, capped to keep (TB, hidden) f32 in vregs. ---
    TB = min(tb_max, _round_up(max(B, 1), 8))
    B_pad = _round_up(B, TB)
    if B_pad != B:
        xp = jnp.zeros((B_pad, c_in), x.dtype).at[:B].set(x)
    else:
        xp = x

    # --- bf16 matmul operands, f32 biases. ---
    xp = xp.astype(jnp.bfloat16)
    w1b = w1.astype(jnp.bfloat16)
    w2b = w2p.astype(jnp.bfloat16)
    b1f = b1.reshape(1, hidden).astype(jnp.float32)
    b2f = b2p.reshape(1, c_out_pad).astype(jnp.float32)

    grid = (B_pad // TB,)
    out = pl.pallas_call(
        _mlp_kernel,
        out_shape=jax.ShapeDtypeStruct((B_pad, c_out_pad), jnp.float32),
        grid_spec=pl.GridSpec(
            grid=grid,
            in_specs=[
                pl.BlockSpec((TB, c_in), lambda i: (i, 0)),          # x tile (pipelined)
                pl.BlockSpec((c_in, hidden), lambda i: (0, 0)),      # W1 (resident)
                pl.BlockSpec((1, hidden), lambda i: (0, 0)),         # b1 (resident)
                pl.BlockSpec((hidden, c_out_pad), lambda i: (0, 0)), # W2 (resident)
                pl.BlockSpec((1, c_out_pad), lambda i: (0, 0)),      # b2 (resident)
            ],
            out_specs=pl.BlockSpec((TB, c_out_pad), lambda i: (i, 0)),
        ),
        compiler_params=pltpu.CompilerParams(
            dimension_semantics=("parallel",),
        ),
    )(xp, w1b, b1f, w2b, b2f)

    return out[:B, :c_out]


def reference_mlp_bf16(x, w1, b1, w2, b2):
    """Same math as the kernel: bf16 matmul operands, f32 accumulation / elementwise."""
    xb = x.astype(jnp.bfloat16)
    w1b = w1.astype(jnp.bfloat16)
    w2b = w2.astype(jnp.bfloat16)
    h = jnp.dot(xb, w1b, preferred_element_type=jnp.float32) + b1
    h = jnp.maximum(h, 0.0)
    y = jnp.dot(h.astype(jnp.bfloat16), w2b, preferred_element_type=jnp.float32) + b2
    return y


if __name__ == "__main__":
    # Module-native small shapes: c_in=16, hidden=128 (default), c_out=32.
    B, c_in, hidden, c_out = 8, 16, 128, 32

    key = jax.random.PRNGKey(0)
    kx, k1, k2, k3, k4 = jax.random.split(key, 5)

    x = jax.random.normal(kx, (B, c_in), dtype=jnp.float32)
    # Deterministic "Kaiming-ish" init; stored as [in, out] (= PyTorch weight.T).
    w1 = jax.random.normal(k1, (c_in, hidden), dtype=jnp.float32) * (1.0 / jnp.sqrt(c_in))
    b1 = jax.random.normal(k2, (hidden,), dtype=jnp.float32) * 0.01
    w2 = jax.random.normal(k3, (hidden, c_out), dtype=jnp.float32) * (1.0 / jnp.sqrt(hidden))
    b2 = jax.random.normal(k4, (c_out,), dtype=jnp.float32) * 0.01

    y = simple_camera_pose_encoder(x, w1, b1, w2, b2)
    y = jax.block_until_ready(y)
    y_ref = reference_mlp_bf16(x, w1, b1, w2, b2)
    assert y.shape == (B, c_out)
    assert jnp.allclose(y, y_ref, atol=1e-2, rtol=1e-2), "mismatch vs reference (small B)"

    # Secondary check: exercise the tiled/padded path (grid > 1, batch padding).
    B2 = 300
    x2 = jax.random.normal(jax.random.PRNGKey(1), (B2, c_in), dtype=jnp.float32)
    y2 = jax.block_until_ready(
        simple_camera_pose_encoder(x2, w1, b1, w2, b2, tb_max=128))
    y2_ref = reference_mlp_bf16(x2, w1, b1, w2, b2)
    assert y2.shape == (B2, c_out)
    assert jnp.allclose(y2, y2_ref, atol=1e-2, rtol=1e-2), "mismatch vs reference (tiled B)"

    print("KERNEL_OK")
</pallas_src>

<mosaic_0001>
module attributes {stable_mosaic.version = 11 : i64} {
  func.func @_mlp_kernel(%arg0: i32, %arg1: memref<8x16xbf16, #tpu.memory_space<vmem>>, %arg2: memref<16x128xbf16, #tpu.memory_space<vmem>>, %arg3: memref<1x128xf32, #tpu.memory_space<vmem>>, %arg4: memref<128x128xbf16, #tpu.memory_space<vmem>>, %arg5: memref<1x128xf32, #tpu.memory_space<vmem>>, %arg6: memref<8x128xf32, #tpu.memory_space<vmem>>) attributes {dimension_semantics = [#tpu.dimension_semantics<parallel>], iteration_bounds = array<i64: 1>, scalar_prefetch = 0 : i64, scratch_operands = 0 : i64, tpu.core_type = #tpu.core_type<tc>, window_params = [{transform_indices = @transform_0, window_bounds = array<i64: 8, 16>}, {pipeline_mode = #tpu.pipeline_mode<synchronous>, transform_indices = @transform_1, window_bounds = array<i64: 16, 128>}, {pipeline_mode = #tpu.pipeline_mode<synchronous>, transform_indices = @transform_2, window_bounds = array<i64: 1, 128>}, {pipeline_mode = #tpu.pipeline_mode<synchronous>, transform_indices = @transform_3, window_bounds = array<i64: 128, 128>}, {pipeline_mode = #tpu.pipeline_mode<synchronous>, transform_indices = @transform_4, window_bounds = array<i64: 1, 128>}, {transform_indices = @transform_5, window_bounds = array<i64: 8, 128>}]} {
    %c0 = arith.constant 0 : index
    %c0_0 = arith.constant 0 : index
    %0 = vector.load %arg1[%c0, %c0_0] : memref<8x16xbf16, #tpu.memory_space<vmem>>, vector<8x16xbf16>
    %c0_1 = arith.constant 0 : index
    %c0_2 = arith.constant 0 : index
    %1 = vector.load %arg2[%c0_1, %c0_2] : memref<16x128xbf16, #tpu.memory_space<vmem>>, vector<16x128xbf16>
    %cst = arith.constant dense<0.000000e+00> : vector<8x128xf32>
    %2 = tpu.matmul %0, %1, %cst {dimension_numbers = #tpu.dot_dimension_numbers<[1], [0], [0], [1], [0, 0, 1, 1], [], []>} : vector<8x16xbf16>, vector<16x128xbf16>, vector<8x128xf32> -> vector<8x128xf32>
    %c0_3 = arith.constant 0 : index
    %c0_4 = arith.constant 0 : index
    %3 = vector.load %arg3[%c0_3, %c0_4] : memref<1x128xf32, #tpu.memory_space<vmem>>, vector<1x128xf32>
    %4 = vector.broadcast %3 : vector<1x128xf32> to vector<8x128xf32>
    %5 = arith.addf %2, %4 : vector<8x128xf32>
    %cst_5 = arith.constant 0.000000e+00 : f32
    %6 = vector.broadcast %cst_5 : f32 to vector<8x128xf32>
    %7 = arith.maximumf %5, %6 : vector<8x128xf32>
    %8 = arith.truncf %7 : vector<8x128xf32> to vector<8x128xbf16>
    %c0_6 = arith.constant 0 : index
    %c0_7 = arith.constant 0 : index
    %9 = vector.load %arg4[%c0_6, %c0_7] : memref<128x128xbf16, #tpu.memory_space<vmem>>, vector<128x128xbf16>
    %cst_8 = arith.constant dense<0.000000e+00> : vector<8x128xf32>
    %10 = tpu.matmul %8, %9, %cst_8 {dimension_numbers = #tpu.dot_dimension_numbers<[1], [0], [0], [1], [0, 0, 1, 1], [], []>} : vector<8x128xbf16>, vector<128x128xbf16>, vector<8x128xf32> -> vector<8x128xf32>
    %c0_9 = arith.constant 0 : index
    %c0_10 = arith.constant 0 : index
    %11 = vector.load %arg5[%c0_9, %c0_10] : memref<1x128xf32, #tpu.memory_space<vmem>>, vector<1x128xf32>
    %12 = vector.broadcast %11 : vector<1x128xf32> to vector<8x128xf32>
    %13 = arith.addf %10, %12 : vector<8x128xf32>
    %c0_11 = arith.constant 0 : index
    %c0_12 = arith.constant 0 : index
    %14 = vector.load %arg6[%c0_11, %c0_12] : memref<8x128xf32, #tpu.memory_space<vmem>>, vector<8x128xf32>
    tpu.vector_store %arg6[%c0_11, %c0_12], %13 {strides = array<i32>} : memref<8x128xf32, #tpu.memory_space<vmem>>, vector<8x128xf32>,
    return
  }
  func.func @transform_0(%arg0: i32) -> (i32, i32) {
    %c0_i32 = arith.constant 0 : i32
    %c0_i32_0 = arith.constant 0 : i32
    return %arg0, %c0_i32 : i32, i32
  }
  func.func @transform_1(%arg0: i32) -> (i32, i32) {
    %c0_i32 = arith.constant 0 : i32
    %c0_i32_0 = arith.constant 0 : i32
    %c0_i32_1 = arith.constant 0 : i32
    return %c0_i32, %c0_i32_0 : i32, i32
  }
  func.func @transform_2(%arg0: i32) -> (i32, i32) {
    %c0_i32 = arith.constant 0 : i32
    %c0_i32_0 = arith.constant 0 : i32
    %c0_i32_1 = arith.constant 0 : i32
    return %c0_i32, %c0_i32_0 : i32, i32
  }
  func.func @transform_3(%arg0: i32) -> (i32, i32) {
    %c0_i32 = arith.constant 0 : i32
    %c0_i32_0 = arith.constant 0 : i32
    %c0_i32_1 = arith.constant 0 : i32
    return %c0_i32, %c0_i32_0 : i32, i32
  }
  func.func @transform_4(%arg0: i32) -> (i32, i32) {
    %c0_i32 = arith.constant 0 : i32
    %c0_i32_0 = arith.constant 0 : i32
    %c0_i32_1 = arith.constant 0 : i32
    return %c0_i32, %c0_i32_0 : i32, i32
  }
  func.func @transform_5(%arg0: i32) -> (i32, i32) {
    %c0_i32 = arith.constant 0 : i32
    %c0_i32_0 = arith.constant 0 : i32
    return %arg0, %c0_i32 : i32, i32
  }
}

</mosaic_0001>

<bundles_post_ra>
// kernel: tpu_custom_call.1
= control target key start
LH: loop header
LB: loop body
LE: loop exit
PB: predicated region body
PF: predicated region fallthrough
CT: control target
= control target key end

     0   :  { %10 = vsyncpa [#allocation3], 0  ;;  %s459_s0 = inlined_call_operand.hbm [shape: bf16[8,16], index: 0, kind: input, shape index: {}]   ;;  %s460_s1 = inlined_call_operand.hbm [shape: bf16[16,128], index: 1, kind: input, shape index: {}]   ;;  %s461_s2 = inlined_call_operand.vmem [shape: f32[1,128], index: 2, kind: input, shape index: {}]   ;;  %s462_s3 = inlined_call_operand.hbm [shape: bf16[128,128], index: 3, kind: input, shape index: {}]   ;;  %s463_s4 = inlined_call_operand.vmem [shape: f32[1,128], index: 4, kind: input, shape index: {}]   ;;  %s464_s5 = inlined_call_operand.hbm [shape: f32[8,128], index: 5, kind: output, shape index: {}]  }
   0x1   :  { %11 = vsyncpa [#allocation6], 0 }
   0x2   :  { %12 = vsyncpa [#allocation4], 0  ;;  %s403_s18 = smov [#allocation5]  }
   0x3   :  { %s28_s19 = sshll.u32 %s403_s18, 4  ;;  %s29_s19 = int_to_ptr.vmem [resolvable:$true] %s28_s19 }
   0x4   :  { %s325_s20 = scalar_lea.vmem %s29_s19, 128  ;;  %p330_p1 = scmp.lt.s32.totalorder %s29_s19, %s29_s19 }
   0x5   :  { %p326_p0 = scmp.ne.s32.totalorder %s29_s19, %s325_s20  ;;  %p331_p2 = scmp.lt.s32.totalorder %s325_s20, %s325_s20 }
   0x7   :  { %p332_p3 = por %p331_p2, %p330_p1 }
   0x9   :  { %p333_p4 = pnand %p332_p3, %p326_p0 }
   0xb   :  { %336 = shalt.err (!%p333_p4)
}
   0xc   :  { %s404_s21 = smov 64   ;;  %s405_s22 = smov 4  }
   0xd   :  { %34 = dma.hbm_to_vmem [thread:$0]  %s460_s1, 128, %s29_s19, [#allocation6], %s404_s21, %s404_s21, %s405_s22  }
   0xe   :  { %s406_s25 = smov [#allocation2]   ;;  %s407_s27 = smov [#allocation7]  }
   0xf   :  { %s19_s26 = sshll.u32 %s406_s25, 4  ;;  %s42_s28 = sshll.u32 %s407_s27, 4  ;;  %s20_s26 = int_to_ptr.vmem [resolvable:$true] %s19_s26  ;;  %s43_s28 = int_to_ptr.vmem [resolvable:$true] %s42_s28 }
  0x10   :  { %s345_s29 = scalar_lea.vmem %s20_s26, 64  ;;  %p350_p6 = scmp.lt.s32.totalorder %s20_s26, %s20_s26 }
  0x11   :  { %p346_p5 = scmp.ne.s32.totalorder %s20_s26, %s345_s29  ;;  %p351_p7 = scmp.lt.s32.totalorder %s345_s29, %s345_s29 }
  0x13   :  { %p352_p8 = por %p351_p7, %p350_p6 }
  0x15   :  { %p353_p9 = pnand %p352_p8, %p346_p5 }
  0x17   :  { %356 = shalt.err (!%p353_p9)
}
  0x18   :  { %22 = dma.hbm_to_vmem [thread:$0]  %s459_s0, 64, %s20_s26, [#allocation3]  }
  0x19   :  { %s365_s7 = scalar_lea.vmem %s43_s28, 1024  ;;  %p370_p11 = scmp.lt.s32.totalorder %s43_s28, %s43_s28 }
  0x1a   :  { %p366_p10 = scmp.ne.s32.totalorder %s43_s28, %s365_s7  ;;  %p371_p12 = scmp.lt.s32.totalorder %s365_s7, %s365_s7 }
  0x1c   :  { %p372_p13 = por %p371_p12, %p370_p11 }
  0x1e   :  { %p373_p0 = pnand %p372_p13, %p366_p10 }
  0x20   :  { %376 = shalt.err (!%p373_p0)
}
  0x21   :  { %48 = dma.hbm_to_vmem [thread:$0]  %s462_s3, 1024, %s43_s28, [#allocation6], %s404_s21, %s404_s21, %s405_s22  }
  0x22   :  { %397 = dma.done.wait [#allocation3], 64  }
  0x23   :  { %398 = vsyncadd [#allocation3], 4294967232 }
  0x24   :  { %399 = dma.done.wait [#allocation6], 1152  }
  0x25   :  { %400 = vsyncadd [#allocation6], 4294966144  ;;  %v408_v0 = vmov 0.0   ;;  %vm409_vm0 = vmmov 0   ;;  %v308_v1 = vld [vmem:[#allocation5] sm:$0xff]   ;;  %vm77_vm1 = vcmask 130048  }
  0x26   :  { %274 = vmatprep.subr.bf16.mxu0 %v408_v0  ;;  %276 = vmatprep.mubr.msk.bf16.mxu0 %vm409_vm0, %v408_v0  ;;  %v61_v2 = vld [vmem:[#allocation2] sm:$0xf]  ;;  %v309_v3 = vld [vmem:[#allocation7 + $0x38] sm:$0xff]   ;;  %v311_v5 = vld [vmem:[#allocation7 + $0x28] sm:$0xff]   ;;  %s410_s11 = smov [#allocation8]  }
  0x27   :  { %280 = vmatprep.subr.bf16.mxu1 %v408_v0  ;;  %296 = vmatprep.mubr.msk.bf16.mxu1 %vm409_vm0, %v408_v0  ;;  %v310_v4 = vld [vmem:[#allocation7 + $0x30] sm:$0xff]   ;;  %v312_v6 = vld [vmem:[#allocation7 + $0x20] sm:$0xff]   ;;  %v313_v7 = vld [vmem:[#allocation7 + $0x18] sm:$0xff]   ;;  %s241_s12 = sshll.u32 %s410_s11, 4  ;;  %s242_s12 = int_to_ptr.vmem [resolvable:$true] %s241_s12 }
  0x28   :  { %275 = vmatpush3.bf16.msra.mxu0 %v308_v1  ;;  %281 = vmatpush3.bf16.msra.mxu1 %v309_v3  ;;  %v314_v8 = vld [vmem:[#allocation7 + $0x10] sm:$0xff]   ;;  %v315_v9 = vld [vmem:[#allocation7 + $0x8] sm:$0xff]   ;;  %v316_v10 = vld [vmem:[#allocation7] sm:$0xff]   ;;  %p382_p2 = scmp.lt.s32.totalorder %s242_s12, %s242_s12 }
  0x29   :  { %282 = vmatprep.subr.bf16.mxu1 %v408_v0  ;;  %v251_v11 = vld [vmem:[%s461_s2] ss:$0 sm:$0xff]  ;;  %s377_s2 = scalar_lea.vmem %s242_s12, 128 }
  0x2a   :  { %v254_v19 = vld [vmem:[%s463_s4] ss:$0 sm:$0xff]  ;;  %p378_p1 = scmp.ne.s32.totalorder %s242_s12, %s377_s2  ;;  %p383_p3 = scmp.lt.s32.totalorder %s377_s2, %s377_s2 }
  0x2b   :  { %277 = vmatmul.mubr.msk.bf16.vlgmr.msra.gmra.mxu0 %vm77_vm1, %v61_v2 }
  0x2c   :  { %283 = vmatpush3.bf16.msra.mxu1 %v310_v4  ;;  %p384_p4 = por %p383_p3, %p382_p2 }
  0x2d   :  { %284 = vmatprep.subr.bf16.mxu1 %v408_v0 }
  0x2e   :  { %p385_p5 = pnand %p384_p4, %p378_p1 }
  0x30   :  { %285 = vmatpush3.bf16.msra.mxu1 %v311_v5 }
  0x31   :  { %286 = vmatprep.subr.bf16.mxu1 %v408_v0 }
  0x34   :  { %287 = vmatpush3.bf16.msra.mxu1 %v312_v6 }
  0x35   :  { %288 = vmatprep.subr.bf16.mxu1 %v408_v0 }
  0x38   :  { %289 = vmatpush3.bf16.msra.mxu1 %v313_v7 }
  0x39   :  { %290 = vmatprep.subr.bf16.mxu1 %v408_v0 }
  0x3c   :  { %291 = vmatpush3.bf16.msra.mxu1 %v314_v8 }
  0x3d   :  { %292 = vmatprep.subr.bf16.mxu1 %v408_v0 }
  0x40   :  { %293 = vmatpush3.bf16.msra.mxu1 %v315_v9 }
  0x41   :  { %294 = vmatprep.subr.bf16.mxu1 %v408_v0 }
  0x44   :  { %295 = vmatpush3.bf16.msra.mxu1 %v316_v10 }
  0xeb   :  { %v115_v12 = vpop.f32.mrf.mxu0 }
  0xec   :  { %v116_v13 = vadd.f32 %v251_v11, %v115_v12 }
  0xed   :  { %v278_v14 = vpop.f32.mrf.mxu0 }
  0xee   :  { %v121_v15 = vmax.f32 %v116_v13, 0.0 }
  0xef   :  { %v118_v16 = vpop.f32.mrf.mxu0 }
  0xf0   :  { %v122_v17 = vpack.c.bf16 %v121_v15, %v121_v15 }
  0xf1   :  { %v279_v18 = vpop.f32.mrf.mxu0 }
  0xf2   :  { %297 = vmatmul.mubr.bf16.vlgmr.msra.gmra.mxu1 %v122_v17 }
 0x1b2   :  { %v228_v20 = vpop.f32.mrf.mxu1 }
 0x1b3   :  { %v229_v21 = vadd.f32 %v254_v19, %v228_v20 }
 0x1b4   :  { %v298_v22 = vpop.f32.mrf.mxu1 }
 0x1b5   :  { %234 = vst [vmem:[#allocation8] sm:$0xff] %v229_v21 }
 0x1b6   :  { %v231_v23 = vpop.f32.mrf.mxu1 }
 0x1b7   :  { %388 = shalt.err (!%p385_p5)
}
 0x1b8   :  { %244 = dma.vmem_to_hbm [thread:$0]  %s242_s12, 128, %s464_s5, [#allocation4]   ;;  %v299_v24 = vpop.f32.mrf.mxu1 }
 0x1b9   :  { %401 = dma.done.wait [#allocation4], 128  }
 0x1ba   :  { %402 = vsyncadd [#allocation4], 4294967168 }
 0x1bb   :  { %248 = vsyncpa [#allocation3], 1 }
 0x1bc   :  { %249 = vsyncpa [#allocation6], 1 }
 0x1bd   :  { %250 = vsyncpa [#allocation4], 1 }

</bundles_post_ra>
